<compile_context>
chip_gen: v5e
topology: v5e:2x2
jax: 0.10.0
libtpu: 0.0.40
codegen_flags: <defaults>
</compile_context>

<pallas_src>
import functools

import jax
import jax.numpy as jnp
import numpy as np
from jax.experimental import pallas as pl
from jax.experimental.pallas import tpu as pltpu


# ----------------------------- helpers -------------------------------------

def _round_up(x, m):
    return ((x + m - 1) // m) * m


def _pick_row_tile(n_rows):
    if n_rows >= 2048:
        return 256
    if n_rows >= 256:
        return 128
    return 16


def _pick_inner_tile(inner):
    if inner <= 512:
        return inner
    for t in (512, 256, 128):
        if inner % t == 0:
            return t
    return inner


# ----------------------------- Pallas kernels ------------------------------

def _gate_kernel(x_ref, wg_ref, scores_ref):
    # x:[tT,H] f32, wg:[H,E] f32 (pre-transposed)  ->  softmax rows of x @ wg.
    logits = jnp.dot(x_ref[...], wg_ref[...], preferred_element_type=jnp.float32)
    m = jnp.max(logits, axis=-1, keepdims=True)
    e = jnp.exp(logits - m)
    scores_ref[...] = e * pl.reciprocal(jnp.sum(e, axis=-1, keepdims=True), approx=True)


def _grouped_ffn_kernel(tile_expert_ref, x_ref, w1_ref, w3_ref, w2_ref, rw_ref,
                        out_ref, acc_ref):
    # grid = (row_tiles, I_tiles); axis 1 is the reduction over the intermediate dim.
    del tile_expert_ref  # only consumed by the BlockSpec index_maps
    i = pl.program_id(1)

    @pl.when(i == 0)
    def _():
        acc_ref[...] = jnp.zeros_like(acc_ref)

    x = x_ref[...]                                                      # [tT, H] bf16
    h1 = jnp.dot(x, w1_ref[...], preferred_element_type=jnp.float32)    # [tT, tI] f32
    h3 = jnp.dot(x, w3_ref[...], preferred_element_type=jnp.float32)    # [tT, tI] f32
    act = h1 * jax.nn.sigmoid(h1) * h3                                  # silu(gate)*up, f32
    acc_ref[...] += jnp.dot(act.astype(w2_ref.dtype), w2_ref[...],      # bf16 LHS -> MXU
                            preferred_element_type=jnp.float32)         # [tT, H] f32

    @pl.when(i == pl.num_programs(1) - 1)
    def _():
        out_ref[...] = (rw_ref[...] * acc_ref[...]).astype(out_ref.dtype)


# ----------------------------- wrappers ------------------------------------

def gate_scores(x_f32, gate_wt):
    """x_f32:[T,H] f32, gate_wt:[H,E] f32 -> softmax scores [T,E] f32."""
    T, H = x_f32.shape
    E = gate_wt.shape[1]
    tT = min(256, _round_up(T, 8))
    T_pad = _round_up(T, tT)
    if T_pad != T:
        x_f32 = jnp.pad(x_f32, ((0, T_pad - T), (0, 0)))
    out = pl.pallas_call(
        _gate_kernel,
        out_shape=jax.ShapeDtypeStruct((T_pad, E), jnp.float32),
        grid=(T_pad // tT,),
        in_specs=[
            pl.BlockSpec((tT, H), lambda t: (t, 0)),
            pl.BlockSpec((H, E), lambda t: (0, 0)),
        ],
        out_specs=pl.BlockSpec((tT, E), lambda t: (t, 0)),
        compiler_params=pltpu.CompilerParams(dimension_semantics=("parallel",)),
    )(x_f32, gate_wt)
    return out[:T]


def grouped_ffn(x_rows, row_w, tile_expert, w1, w3, w2, *, row_tile, out_dtype):
    """out[r] = row_w[r] * FFN_{expert(tile_of(r))}(x_rows[r]).

    x_rows:[R,H] bf16 (R multiple of row_tile), row_w:[R,1] f32,
    tile_expert:[R//row_tile] int32 (scalar-prefetched),
    w1/w3:[E,H,I] bf16, w2:[E,I,H] bf16.
    """
    R, H = x_rows.shape
    E_tot, _, I = w1.shape
    tI = _pick_inner_tile(I)
    # keep double-buffered bf16 weight tiles within a conservative budget (v7x: 64 MiB VMEM)
    while tI % 256 == 0 and (2 * 3 * H * tI * 2) > (32 << 20):
        tI //= 2
    grid = (R // row_tile, I // tI)

    est_vmem = (2 * 3 * H * tI * 2                                   # w1/w3/w2 tiles, 2x buffered
                + 2 * row_tile * H * (2 + jnp.dtype(out_dtype).itemsize)  # x + out tiles
                + row_tile * H * 4 + 4 * row_tile)                   # f32 acc + row weights
    cparams = dict(dimension_semantics=("parallel", "arbitrary"))
    if est_vmem > 12 * (1 << 20):
        cparams["vmem_limit_bytes"] = int(min(est_vmem + (16 << 20), 64 << 20))

    return pl.pallas_call(
        _grouped_ffn_kernel,
        out_shape=jax.ShapeDtypeStruct((R, H), out_dtype),
        grid_spec=pltpu.PrefetchScalarGridSpec(
            num_scalar_prefetch=1,
            grid=grid,
            in_specs=[
                pl.BlockSpec((row_tile, H), lambda g, i, te: (g, 0)),
                pl.BlockSpec((None, H, tI), lambda g, i, te: (te[g], 0, i)),
                pl.BlockSpec((None, H, tI), lambda g, i, te: (te[g], 0, i)),
                pl.BlockSpec((None, tI, H), lambda g, i, te: (te[g], i, 0)),
                pl.BlockSpec((row_tile, 1), lambda g, i, te: (g, 0)),
            ],
            out_specs=pl.BlockSpec((row_tile, H), lambda g, i, te: (g, 0)),
            scratch_shapes=[pltpu.VMEM((row_tile, H), jnp.float32)],
        ),
        compiler_params=pltpu.CompilerParams(**cparams),
    )(tile_expert, x_rows, w1, w3, w2, row_w)


# ----------------------------- DeepseekMoE forward --------------------------

def deepseek_moe_forward(hidden_states, params, cfg):
    """Eval-mode DeepseekMoE forward. hidden_states: [bsz, seq, hidden]."""
    bsz, seq_len, H = hidden_states.shape
    E = cfg["n_routed_experts"]
    K = cfg["num_experts_per_tok"]
    has_shared = cfg["n_shared_experts"] is not None
    shared_fused = has_shared and ("sw1" not in params)

    x = hidden_states.reshape(-1, H)
    T = x.shape[0]
    N = T * K

    # ---- MoEGate (f32, matches reference) ----
    scores = gate_scores(x.astype(jnp.float32), params["gate_wt"])         # [T, E]
    topk_w, topk_idx = jax.lax.top_k(scores, K)
    if K > 1 and cfg["norm_topk_prob"]:
        topk_w = topk_w / (jnp.sum(topk_w, axis=-1, keepdims=True) + 1e-20)
    else:
        topk_w = topk_w * cfg["routed_scaling_factor"]

    # ---- sparse grouped dispatch (moe_infer equivalent) ----
    tT = _pick_row_tile(N)
    flat_idx = topk_idx.reshape(-1).astype(jnp.int32)                      # [N]
    flat_w = topk_w.reshape(-1).astype(jnp.float32)                        # [N]
    order = jnp.argsort(flat_idx)                                          # sort rows by expert
    sorted_e = flat_idx[order]
    sorted_tok = (order // K).astype(jnp.int32)
    sorted_w = flat_w[order]

    counts = jnp.zeros((E,), jnp.int32).at[flat_idx].add(1)                # tokens per expert
    padded_counts = _round_up(counts, tT)                                  # pad each group to tT
    padded_ends = jnp.cumsum(padded_counts)
    padded_starts = padded_ends - padded_counts
    starts = jnp.cumsum(counts) - counts
    pos = padded_starts[sorted_e] + (jnp.arange(N, dtype=jnp.int32) - starts[sorted_e])

    ROUTED_PAD = _round_up(N, tT) + min(E, N) * tT                         # static upper bound
    G_routed = ROUTED_PAD // tT
    tok_of_row = jnp.zeros((ROUTED_PAD,), jnp.int32).at[pos].set(sorted_tok)
    w_of_row = jnp.zeros((ROUTED_PAD,), jnp.float32).at[pos].set(sorted_w)
    tile_expert = jnp.searchsorted(
        padded_ends, jnp.arange(G_routed, dtype=jnp.int32) * tT, side="right")
    tile_expert = jnp.minimum(tile_expert, E - 1).astype(jnp.int32)        # clamp unused tail

    if shared_fused:
        # shared experts ride along as expert index E with weight 1.0 for every token
        SHARED_PAD = _round_up(T, tT)
        srows = jnp.arange(SHARED_PAD, dtype=jnp.int32)
        tok_of_row = jnp.concatenate([tok_of_row, jnp.minimum(srows, T - 1)])
        w_of_row = jnp.concatenate([w_of_row, (srows < T).astype(jnp.float32)])
        tile_expert = jnp.concatenate(
            [tile_expert, jnp.full((SHARED_PAD // tT,), E, jnp.int32)])

    x_bf16 = x.astype(jnp.bfloat16)
    out_dtype = hidden_states.dtype if hidden_states.dtype == jnp.bfloat16 else jnp.float32
    out_rows = grouped_ffn(
        x_bf16[tok_of_row], w_of_row[:, None], tile_expert,
        params["w1"], params["w3"], params["w2"],
        row_tile=tT, out_dtype=out_dtype)

    # ---- un-permute + combine (combine weights already applied in-kernel) ----
    inv_pos = jnp.zeros((N,), jnp.int32).at[order].set(pos)
    y = out_rows[inv_pos].astype(jnp.float32).reshape(T, K, H).sum(axis=1)

    if shared_fused:
        y = y + out_rows[ROUTED_PAD:ROUTED_PAD + T].astype(jnp.float32)
    elif has_shared:
        # different intermediate size -> shared experts need their own grouped call
        SHARED_PAD = _round_up(T, tT)
        srows = jnp.arange(SHARED_PAD, dtype=jnp.int32)
        shared_out = grouped_ffn(
            x_bf16[jnp.minimum(srows, T - 1)],
            (srows < T).astype(jnp.float32)[:, None],
            jnp.zeros((SHARED_PAD // tT,), jnp.int32),
            params["sw1"], params["sw3"], params["sw2"],
            row_tile=tT, out_dtype=out_dtype)
        y = y + shared_out[:T].astype(jnp.float32)

    return y.reshape(bsz, seq_len, H).astype(hidden_states.dtype)


# ----------------------------- params --------------------------------------

def init_params(key, cfg):
    H = cfg["hidden_size"]
    I = cfg["moe_intermediate_size"]
    E = cfg["n_routed_experts"]
    ks = jax.random.split(key, 7)
    s = 0.02
    p = {
        "gate_w": jax.random.normal(ks[0], (E, H), jnp.float32) * s,     # MoEGate.weight [E,H]
        "w1": jax.random.normal(ks[1], (E, H, I), jnp.float32) * s,      # gate proj (x @ W)
        "w3": jax.random.normal(ks[2], (E, H, I), jnp.float32) * s,      # up proj
        "w2": jax.random.normal(ks[3], (E, I, H), jnp.float32) * s,      # down proj
    }
    if cfg["n_shared_experts"] is not None:
        Is = I * cfg["n_shared_experts"]
        p.update({
            "sw1": jax.random.normal(ks[4], (1, H, Is), jnp.float32) * s,
            "sw3": jax.random.normal(ks[5], (1, H, Is), jnp.float32) * s,
            "sw2": jax.random.normal(ks[6], (1, Is, H), jnp.float32) * s,
        })
    return p


def prepare_params(raw, cfg):
    """One-time prep (outside jit): bf16 weights, [H,E] gate, shared expert fused when possible."""
    p = {"gate_wt": jnp.asarray(raw["gate_w"], jnp.float32).T}            # [H, E]
    w1 = jnp.asarray(raw["w1"], jnp.bfloat16)
    w3 = jnp.asarray(raw["w3"], jnp.bfloat16)
    w2 = jnp.asarray(raw["w2"], jnp.bfloat16)
    if cfg["n_shared_experts"] is not None:
        sw1 = jnp.asarray(raw["sw1"], jnp.bfloat16)
        sw3 = jnp.asarray(raw["sw3"], jnp.bfloat16)
        sw2 = jnp.asarray(raw["sw2"], jnp.bfloat16)
        if sw1.shape[-1] == w1.shape[-1]:        # same intermediate size -> fuse as expert E
            w1 = jnp.concatenate([w1, sw1], axis=0)
            w3 = jnp.concatenate([w3, sw3], axis=0)
            w2 = jnp.concatenate([w2, sw2], axis=0)
        else:
            p.update({"sw1": sw1, "sw3": sw3, "sw2": sw2})
    p.update({"w1": w1, "w3": w3, "w2": w2})
    return p


# ----------------------------- pure-JAX reference (self-check) -------------

def _reference_forward(hidden_states, raw, cfg, scores=None):
    bsz, seq_len, H = hidden_states.shape
    E = cfg["n_routed_experts"]
    K = cfg["num_experts_per_tok"]
    x = hidden_states.reshape(-1, H)
    if scores is None:
        logits = x.astype(jnp.float32) @ raw["gate_w"].astype(jnp.float32).T
        scores = jax.nn.softmax(logits, axis=-1)
    tw, ti = jax.lax.top_k(scores, K)
    if K > 1 and cfg["norm_topk_prob"]:
        tw = tw / (jnp.sum(tw, axis=-1, keepdims=True) + 1e-20)
    else:
        tw = tw * cfg["routed_scaling_factor"]
    combine = jnp.einsum("tk,tke->te", tw, jax.nn.one_hot(ti, E, dtype=jnp.float32))

    xb = x.astype(jnp.bfloat16)

    def ffn(w1, w3, w2):
        h1 = jnp.dot(xb, w1.astype(jnp.bfloat16), preferred_element_type=jnp.float32)
        h3 = jnp.dot(xb, w3.astype(jnp.bfloat16), preferred_element_type=jnp.float32)
        act = (h1 * jax.nn.sigmoid(h1) * h3).astype(jnp.bfloat16)
        return jnp.dot(act, w2.astype(jnp.bfloat16), preferred_element_type=jnp.float32)

    y = jnp.zeros((x.shape[0], H), jnp.float32)
    for e in range(E):
        y = y + combine[:, e:e + 1] * ffn(raw["w1"][e], raw["w3"][e], raw["w2"][e])
    if cfg["n_shared_experts"] is not None:
        y = y + ffn(raw["sw1"][0], raw["sw3"][0], raw["sw2"][0])
    return y.reshape(bsz, seq_len, H).astype(hidden_states.dtype)


# ----------------------------- setup & run ----------------------------------

if __name__ == "__main__":
    cfg = dict(
        hidden_size=32,
        moe_intermediate_size=64,
        n_routed_experts=8,
        num_experts_per_tok=2,
        n_shared_experts=1,
        norm_topk_prob=True,
        routed_scaling_factor=1.0,
    )
    key = jax.random.PRNGKey(0)
    kx, kp = jax.random.split(key)
    bsz, seq = 2, 8
    hidden_states = jax.random.normal(kx, (bsz, seq, cfg["hidden_size"]), jnp.float32)

    raw = init_params(kp, cfg)
    params = prepare_params(raw, cfg)

    fwd = jax.jit(functools.partial(deepseek_moe_forward, cfg=cfg))
    out = fwd(hidden_states, params)
    out = jax.block_until_ready(out)
    assert out.shape == hidden_states.shape and out.dtype == hidden_states.dtype

    # self-check vs a pure-JAX dense reference (same routing scores & bf16 weights)
    x_flat = hidden_states.reshape(-1, cfg["hidden_size"]).astype(jnp.float32)
    scores_k = gate_scores(x_flat, params["gate_wt"])
    ref = _reference_forward(hidden_states, raw, cfg, scores=scores_k)
    np.testing.assert_allclose(np.asarray(out, np.float32), np.asarray(ref, np.float32),
                               rtol=5e-2, atol=1e-4)

    print("KERNEL_OK")
</pallas_src>

<mosaic_0001>
module attributes {stable_mosaic.version = 11 : i64} {
  func.func @_gate_kernel(%arg0: i32, %arg1: memref<16x32xf32, #tpu.memory_space<vmem>>, %arg2: memref<32x8xf32, #tpu.memory_space<vmem>>, %arg3: memref<16x8xf32, #tpu.memory_space<vmem>>) attributes {dimension_semantics = [#tpu.dimension_semantics<parallel>], iteration_bounds = array<i64: 1>, scalar_prefetch = 0 : i64, scratch_operands = 0 : i64, tpu.core_type = #tpu.core_type<tc>, window_params = [{transform_indices = @transform_0, window_bounds = array<i64: 16, 32>}, {pipeline_mode = #tpu.pipeline_mode<synchronous>, transform_indices = @transform_1, window_bounds = array<i64: 32, 8>}, {transform_indices = @transform_2, window_bounds = array<i64: 16, 8>}]} {
    %c0 = arith.constant 0 : index
    %c0_0 = arith.constant 0 : index
    %0 = vector.load %arg1[%c0, %c0_0] : memref<16x32xf32, #tpu.memory_space<vmem>>, vector<16x32xf32>
    %c0_1 = arith.constant 0 : index
    %c0_2 = arith.constant 0 : index
    %1 = vector.load %arg2[%c0_1, %c0_2] : memref<32x8xf32, #tpu.memory_space<vmem>>, vector<32x8xf32>
    %cst = arith.constant dense<0.000000e+00> : vector<16x8xf32>
    %2 = tpu.matmul %0, %1, %cst {dimension_numbers = #tpu.dot_dimension_numbers<[1], [0], [0], [1], [0, 0, 1, 1], [], []>} : vector<16x32xf32>, vector<32x8xf32>, vector<16x8xf32> -> vector<16x8xf32>
    %cst_3 = arith.constant dense<0xFF800000> : vector<16xf32>
    %3 = vector.multi_reduction <maximumf>, %2, %cst_3 [1] : vector<16x8xf32> to vector<16xf32>
    %4 = vector.shape_cast %3 : vector<16xf32> to vector<16x1xf32>
    %5 = vector.broadcast %4 : vector<16x1xf32> to vector<16x8xf32>
    %6 = arith.subf %2, %5 : vector<16x8xf32>
    %7 = math.exp %6 : vector<16x8xf32>
    %cst_4 = arith.constant dense<0.000000e+00> : vector<16xf32>
    %8 = vector.multi_reduction <add>, %7, %cst_4 [1] : vector<16x8xf32> to vector<16xf32>
    %9 = vector.shape_cast %8 : vector<16xf32> to vector<16x1xf32>
    %10 = tpu.reciprocal %9 {approx = true} : vector<16x1xf32> -> vector<16x1xf32>
    %11 = vector.broadcast %10 : vector<16x1xf32> to vector<16x8xf32>
    %12 = arith.mulf %7, %11 : vector<16x8xf32>
    %c0_5 = arith.constant 0 : index
    %c0_6 = arith.constant 0 : index
    %13 = vector.load %arg3[%c0_5, %c0_6] : memref<16x8xf32, #tpu.memory_space<vmem>>, vector<16x8xf32>
    tpu.vector_store %arg3[%c0_5, %c0_6], %12 {strides = array<i32>} : memref<16x8xf32, #tpu.memory_space<vmem>>, vector<16x8xf32>,
    return
  }
  func.func @transform_0(%arg0: i32) -> (i32, i32) {
    %c0_i32 = arith.constant 0 : i32
    %c0_i32_0 = arith.constant 0 : i32
    return %arg0, %c0_i32 : i32, i32
  }
  func.func @transform_1(%arg0: i32) -> (i32, i32) {
    %c0_i32 = arith.constant 0 : i32
    %c0_i32_0 = arith.constant 0 : i32
    %c0_i32_1 = arith.constant 0 : i32
    return %c0_i32, %c0_i32_0 : i32, i32
  }
  func.func @transform_2(%arg0: i32) -> (i32, i32) {
    %c0_i32 = arith.constant 0 : i32
    %c0_i32_0 = arith.constant 0 : i32
    return %arg0, %c0_i32 : i32, i32
  }
}

module attributes {stable_mosaic.version = 11 : i64} {
  func.func @_grouped_ffn_kernel(%arg0: i32, %arg1: i32, %arg2: memref<11xi32, #tpu.memory_space<smem>>, %arg3: memref<16x32xbf16, #tpu.memory_space<vmem>>, %arg4: memref<1x32x64xbf16, #tpu.memory_space<vmem>>, %arg5: memref<1x32x64xbf16, #tpu.memory_space<vmem>>, %arg6: memref<1x64x32xbf16, #tpu.memory_space<vmem>>, %arg7: memref<16x1xf32, #tpu.memory_space<vmem>>, %arg8: memref<16x32xf32, #tpu.memory_space<vmem>>, %arg9: memref<16x32xf32, #tpu.memory_space<vmem>>) attributes {dimension_semantics = [#tpu.dimension_semantics<parallel>, #tpu.dimension_semantics<arbitrary>], iteration_bounds = array<i64: 11, 1>, scalar_prefetch = 1 : i64, scratch_operands = 1 : i64, tpu.core_type = #tpu.core_type<tc>, window_params = [{transform_indices = @transform_0, window_bounds = array<i64: 16, 32>}, {transform_indices = @transform_1, window_bounds = array<i64: 1, 32, 64>}, {transform_indices = @transform_2, window_bounds = array<i64: 1, 32, 64>}, {transform_indices = @transform_3, window_bounds = array<i64: 1, 64, 32>}, {transform_indices = @transform_4, window_bounds = array<i64: 16, 1>}, {transform_indices = @transform_5, window_bounds = array<i64: 16, 32>}]} {
    %c0_i32 = arith.constant 0 : i32
    %0 = arith.cmpi eq, %arg1, %c0_i32 : i32
    %1 = arith.extui %0 : i1 to i32
    %c0_i32_0 = arith.constant 0 : i32
    %2 = arith.cmpi ne, %1, %c0_i32_0 : i32
    scf.if %2 {
      %cst_20 = arith.constant 0.000000e+00 : f32
      %27 = vector.broadcast %cst_20 : f32 to vector<16x32xf32>
      %c0_21 = arith.constant 0 : index
      %c0_22 = arith.constant 0 : index
      %28 = vector.load %arg9[%c0_21, %c0_22] : memref<16x32xf32, #tpu.memory_space<vmem>>, vector<16x32xf32>
      tpu.vector_store %arg9[%c0_21, %c0_22], %27 {strides = array<i32>} : memref<16x32xf32, #tpu.memory_space<vmem>>, vector<16x32xf32>,
    } else {
    }
    %c0 = arith.constant 0 : index
    %c0_1 = arith.constant 0 : index
    %3 = vector.load %arg3[%c0, %c0_1] : memref<16x32xbf16, #tpu.memory_space<vmem>>, vector<16x32xbf16>
    %c0_2 = arith.constant 0 : index
    %c0_3 = arith.constant 0 : index
    %c0_4 = arith.constant 0 : index
    %4 = vector.load %arg4[%c0_2, %c0_3, %c0_4] : memref<1x32x64xbf16, #tpu.memory_space<vmem>>, vector<1x32x64xbf16>
    %5 = vector.shape_cast %4 : vector<1x32x64xbf16> to vector<32x64xbf16>
    %cst = arith.constant dense<0.000000e+00> : vector<16x64xf32>
    %6 = tpu.matmul %3, %5, %cst {dimension_numbers = #tpu.dot_dimension_numbers<[1], [0], [0], [1], [0, 0, 1, 1], [], []>} : vector<16x32xbf16>, vector<32x64xbf16>, vector<16x64xf32> -> vector<16x64xf32>
    %c0_5 = arith.constant 0 : index
    %c0_6 = arith.constant 0 : index
    %c0_7 = arith.constant 0 : index
    %7 = vector.load %arg5[%c0_5, %c0_6, %c0_7] : memref<1x32x64xbf16, #tpu.memory_space<vmem>>, vector<1x32x64xbf16>
    %8 = vector.shape_cast %7 : vector<1x32x64xbf16> to vector<32x64xbf16>
    %cst_8 = arith.constant dense<0.000000e+00> : vector<16x64xf32>
    %9 = tpu.matmul %3, %8, %cst_8 {dimension_numbers = #tpu.dot_dimension_numbers<[1], [0], [0], [1], [0, 0, 1, 1], [], []>} : vector<16x32xbf16>, vector<32x64xbf16>, vector<16x64xf32> -> vector<16x64xf32>
    %10 = arith.negf %6 : vector<16x64xf32>
    %11 = math.exp %10 : vector<16x64xf32>
    %cst_9 = arith.constant 1.000000e+00 : f32
    %12 = vector.broadcast %cst_9 : f32 to vector<16x64xf32>
    %13 = arith.addf %12, %11 : vector<16x64xf32>
    %14 = arith.divf %12, %13 : vector<16x64xf32>
    %15 = arith.mulf %6, %14 : vector<16x64xf32>
    %16 = arith.mulf %15, %9 : vector<16x64xf32>
    %c0_10 = arith.constant 0 : index
    %c0_11 = arith.constant 0 : index
    %17 = vector.load %arg9[%c0_10, %c0_11] : memref<16x32xf32, #tpu.memory_space<vmem>>, vector<16x32xf32>
    %18 = arith.truncf %16 : vector<16x64xf32> to vector<16x64xbf16>
    %c0_12 = arith.constant 0 : index
    %c0_13 = arith.constant 0 : index
    %c0_14 = arith.constant 0 : index
    %19 = vector.load %arg6[%c0_12, %c0_13, %c0_14] : memref<1x64x32xbf16, #tpu.memory_space<vmem>>, vector<1x64x32xbf16>
    %20 = vector.shape_cast %19 : vector<1x64x32xbf16> to vector<64x32xbf16>
    %cst_15 = arith.constant dense<0.000000e+00> : vector<16x32xf32>
    %21 = tpu.matmul %18, %20, %cst_15 {dimension_numbers = #tpu.dot_dimension_numbers<[1], [0], [0], [1], [0, 0, 1, 1], [], []>} : vector<16x64xbf16>, vector<64x32xbf16>, vector<16x32xf32> -> vector<16x32xf32>
    %22 = arith.addf %17, %21 : vector<16x32xf32>
    %c0_16 = arith.constant 0 : index
    %c0_17 = arith.constant 0 : index
    %23 = vector.load %arg9[%c0_16, %c0_17] : memref<16x32xf32, #tpu.memory_space<vmem>>, vector<16x32xf32>
    tpu.vector_store %arg9[%c0_16, %c0_17], %22 {strides = array<i32>} : memref<16x32xf32, #tpu.memory_space<vmem>>, vector<16x32xf32>,
    %c0_i32_18 = arith.constant 0 : i32
    %24 = arith.cmpi eq, %arg1, %c0_i32_18 : i32
    %25 = arith.extui %24 : i1 to i32
    %c0_i32_19 = arith.constant 0 : i32
    %26 = arith.cmpi ne, %25, %c0_i32_19 : i32
    scf.if %26 {
      %c0_20 = arith.constant 0 : index
      %c0_21 = arith.constant 0 : index
      %27 = vector.load %arg7[%c0_20, %c0_21] : memref<16x1xf32, #tpu.memory_space<vmem>>, vector<16x1xf32>
      %c0_22 = arith.constant 0 : index
      %c0_23 = arith.constant 0 : index
      %28 = vector.load %arg9[%c0_22, %c0_23] : memref<16x32xf32, #tpu.memory_space<vmem>>, vector<16x32xf32>
      %29 = vector.broadcast %27 : vector<16x1xf32> to vector<16x32xf32>
      %30 = arith.mulf %29, %28 : vector<16x32xf32>
      %c0_24 = arith.constant 0 : index
      %c0_25 = arith.constant 0 : index
      %31 = vector.load %arg8[%c0_24, %c0_25] : memref<16x32xf32, #tpu.memory_space<vmem>>, vector<16x32xf32>
      tpu.vector_store %arg8[%c0_24, %c0_25], %30 {strides = array<i32>} : memref<16x32xf32, #tpu.memory_space<vmem>>, vector<16x32xf32>,
    } else {
    }
    return
  }
  func.func @transform_0(%arg0: i32, %arg1: i32, %arg2: memref<11xi32, #tpu.memory_space<smem>>) -> (i32, i32) {
    %c0_i32 = arith.constant 0 : i32
    %c0_i32_0 = arith.constant 0 : i32
    return %arg0, %c0_i32 : i32, i32
  }
  func.func @transform_1(%arg0: i32, %arg1: i32, %arg2: memref<11xi32, #tpu.memory_space<smem>>) -> (i32, i32, i32) {
    %0 = arith.index_cast %arg0 : i32 to index
    %1 = memref.load %arg2[%0] : memref<11xi32, #tpu.memory_space<smem>>
    %c0_i32 = arith.constant 0 : i32
    %c0_i32_0 = arith.constant 0 : i32
    return %1, %c0_i32, %arg1 : i32, i32, i32
  }
  func.func @transform_2(%arg0: i32, %arg1: i32, %arg2: memref<11xi32, #tpu.memory_space<smem>>) -> (i32, i32, i32) {
    %0 = arith.index_cast %arg0 : i32 to index
    %1 = memref.load %arg2[%0] : memref<11xi32, #tpu.memory_space<smem>>
    %c0_i32 = arith.constant 0 : i32
    %c0_i32_0 = arith.constant 0 : i32
    return %1, %c0_i32, %arg1 : i32, i32, i32
  }
  func.func @transform_3(%arg0: i32, %arg1: i32, %arg2: memref<11xi32, #tpu.memory_space<smem>>) -> (i32, i32, i32) {
    %0 = arith.index_cast %arg0 : i32 to index
    %1 = memref.load %arg2[%0] : memref<11xi32, #tpu.memory_space<smem>>
    %c0_i32 = arith.constant 0 : i32
    %c0_i32_0 = arith.constant 0 : i32
    return %1, %arg1, %c0_i32 : i32, i32, i32
  }
  func.func @transform_4(%arg0: i32, %arg1: i32, %arg2: memref<11xi32, #tpu.memory_space<smem>>) -> (i32, i32) {
    %c0_i32 = arith.constant 0 : i32
    %c0_i32_0 = arith.constant 0 : i32
    return %arg0, %c0_i32 : i32, i32
  }
  func.func @transform_5(%arg0: i32, %arg1: i32, %arg2: memref<11xi32, #tpu.memory_space<smem>>) -> (i32, i32) {
    %c0_i32 = arith.constant 0 : i32
    %c0_i32_0 = arith.constant 0 : i32
    return %arg0, %c0_i32 : i32, i32
  }
}

</mosaic_0001>

<bundles_post_ra>
// kernel: deepseek_moe_forward.2
= control target key start
LH: loop header
LB: loop body
LE: loop exit
PB: predicated region body
PF: predicated region fallthrough
CT: control target
= control target key end

     0   :  { %vm17_vm0 = vcmask 261120   ;;  %vm47_vm1 = vcmask 64512   ;;  %s135_s1 = inlined_call_operand.vmem [shape: f32[32,8], index: 1, kind: input, shape index: {}]   ;;  %s136_s0 = inlined_call_operand.vmem [shape: f32[16,32], index: 0, kind: input, shape index: {}]   ;;  %s137_s2 = inlined_call_operand.vmem [shape: f32[16,8], index: 2, kind: output, shape index: {}]  }
   0x1   :  { %v16_v0 = vld [vmem:[%s135_s1 + $0x18] sm:$0xff]  ;;  %v15_v1 = vld [vmem:[%s135_s1 + $0x10] sm:$0xff]  ;;  %v14_v2 = vld [vmem:[%s135_s1 + $0x8] sm:$0xff] }
   0x2   :  { %36 = vmatpush.msra.mxu0 %v16_v0  ;;  %78 = vmatpush.msra.mxu1 %v16_v0  ;;  %v13_v3 = vld [vmem:[%s135_s1] sm:$0xff]  ;;  %v12_v5 = vld [vmem:[%s136_s0 + $0x8] sm:$0xff] }
   0x3   :  { %v11_v4 = vld [vmem:[%s136_s0] sm:$0xff] }
   0x4   :  { %37 = vmatpush.msra.mxu0 %v15_v1  ;;  %79 = vmatpush.msra.mxu1 %v15_v1 }
   0x6   :  { %38 = vmatpush.msra.mxu0 %v14_v2  ;;  %80 = vmatpush.msra.mxu1 %v14_v2 }
   0x8   :  { %39 = vmatpush.msra.mxu0 %v13_v3  ;;  %81 = vmatpush.msra.mxu1 %v13_v3 }
   0x9   :  { %76 = vmatmul.msk.f32.vlgmr.msra.gmra.mxu0 %vm17_vm0, %v11_v4  ;;  %77 = vmatmul.msk.f32.vlgmr.msra.gmra.mxu1 %vm17_vm0, %v12_v5 }
  0x86   :  { %v41_v6 = vpop.f32.mrf.mxu0  ;;  %v44_v8 = vpop.f32.mrf.mxu1 }
  0x87   :  { %v48_v7 = vsel %vm47_vm1, %v41_v6, -inf  ;;  %v51_v9 = vsel %vm47_vm1, %v44_v8, -inf }
  0x88   :  { %49 = vmax.xlane.f32.xlu0 %v48_v7 }
  0x90   :  { %52 = vmax.xlane.f32.xlu0 %v51_v9 }
  0xfb   :  { %v50_v10 = vpop.xlane.xlu0 %49 }
  0xfc   :  { %v54_v11 = vsub.f32 %v41_v6, %v50_v10 }
  0xfe   :  { %v56_v12 = vmul.f32 1.442695, %v54_v11 }
 0x100   :  { %82 = vpow2.f32 %v56_v12 }
 0x103   :  { %v53_v13 = vpop.xlane.xlu0 %52 }
 0x104   :  { %v55_v14 = vsub.f32 %v44_v8, %v53_v13 }
 0x106   :  { %v83_v15 = vpop.eup %82  ;;  %v58_v16 = vmul.f32 1.442695, %v55_v14 }
 0x107   :  { %v60_v17 = vsel %vm47_vm1, %v83_v15, 0.0 }
 0x108   :  { %84 = vpow2.f32 %v58_v16  ;;  %61 = vadd.xlane.f32.xlu1 %v60_v17 }
 0x10e   :  { %v85_v18 = vpop.eup %84 }
 0x10f   :  { %v63_v19 = vsel %vm47_vm1, %v85_v18, 0.0 }
 0x110   :  { %64 = vadd.xlane.f32.xlu1 %v63_v19 }
 0x17b   :  { %v62_v20 = vpop.xlane.xlu1 %61 }
 0x17c   :  { %86 = vrcp.f32 %v62_v20 }
 0x182   :  { %v87_v21 = vpop.eup %86 }
 0x183   :  { %v68_v22 = vmul.f32 %v87_v21, %v83_v15  ;;  %v65_v23 = vpop.xlane.xlu1 %64 }
 0x184   :  { %88 = vrcp.f32 %v65_v23 }
 0x185   :  { %70 = vst.msk [vmem:[%s137_s2] sm:$0xff] %vm47_vm1, %v68_v22 }
 0x18a   :  { %v89_v24 = vpop.eup %88 }
 0x18b   :  { %v69_v25 = vmul.f32 %v89_v24, %v85_v18 }
 0x18d   :  { %71 = vst.msk [vmem:[%s137_s2 + $0x8] sm:$0xff] %vm47_vm1, %v69_v25 }

// kernel: custom-call
= control target key start
LH: loop header
LB: loop body
LE: loop exit
PB: predicated region body
PF: predicated region fallthrough
CT: control target
= control target key end

     0   :  { %s6_s0 = inlined_call_operand.vmem [shape: u32[10], index: 0, kind: output, shape index: {}]  }

// kernel: deepseek_moe_forward.3
= control target key start
LH: loop header
LB: loop body
LE: loop exit
PB: predicated region body
PF: predicated region fallthrough
CT: control target
= control target key end

     0   :  { %s866_s24 = smov [#allocation4]   ;;  %s974_s0 = inlined_call_operand.vmem [shape: s32[11], index: 0, kind: input, shape index: {}]   ;;  %s975_s1 = inlined_call_operand.vmem [shape: bf16[176,32], index: 1, kind: input, shape index: {}]   ;;  %s976_s2 = inlined_call_operand.vmem [shape: bf16[9,32,64], index: 2, kind: input, shape index: {}]   ;;  %s977_s3 = inlined_call_operand.vmem [shape: bf16[9,32,64], index: 3, kind: input, shape index: {}]   ;;  %s978_s4 = inlined_call_operand.vmem [shape: bf16[9,64,32], index: 4, kind: input, shape index: {}]   ;;  %s979_s5 = inlined_call_operand.vmem [shape: f32[176,1], index: 5, kind: input, shape index: {}]   ;;  %s980_s6 = inlined_call_operand.vmem [shape: f32[176,32], index: 6, kind: output, shape index: {}]  }
   0x1   :  { %s12_s23 = sshll.u32 %s974_s0, 4  ;;  %s13_s23 = int_to_ptr.vmem [resolvable:$true] %s12_s23 }
   0x2   :  { %15 = dma.vmem_to_smem %s13_s23, 16, %s866_s24, [#allocation3] }
   0x3   :  { %852 = dma.done.wait [#allocation3], 16 }
   0x4   :  { %853 = vsyncadd [#allocation3], 4294967280 }
   0x5   :  { %18 = sfence }
   0x6   :  { %s907_s25 = smov 0   ;;  %s909_s26 = smov 0  }
   0x7   :  { %s911_s27 = smov 0  }
   0x8 LB: > { %s36_s0 = sadd.s32 1, %s860_s26  ;;  %p724_p0 = scmp.ge.s32.totalorder %s864_s27, 1  ;;  %s864_s27 = sphi %s911_s27, %s24_s27   ;;  %s860_s26 = sphi %s909_s26, %s982_s26   ;;  %s856_s25 = sphi %s907_s25, %s981_s25  }
   0x9   : > { %p38_p1 = scmp.ge.s32.totalorder %s36_s0, 11  ;;  %p279_p2 = scmp.lt.s32.totalorder %s864_s27, 12 }
   0xb   : > { %s984_s0 = smov (%p38_p1, %s36_s0), 0  ;;  %p280_p3 = pnand %p724_p0, %p279_p2 }
   0xc   : > { %s346_s28 = sld [smem:[#allocation4 + %s856_s25]] (!%p280_p3)  ;;  %s725_s29 = sshll.u32 (!%p280_p3), %s856_s25, 1 }
   0xd   : > { %283 = sbr.rel (%p280_p3) target bundleno = 352 (0x160), region = 40  ;;  %p341_p4 = scmp.lt.s32.totalorder (!%p280_p3), %s725_s29, 21 }
   0xe   : > { %s356_s30 = sld [smem:[#allocation4 + %s856_s25]] (!%p280_p3) }
   0xf   : > { %s366_s19 = sld [smem:[#allocation4 + %s856_s25]] (!%p280_p3) }
  0x12   : > { %s986_s29 = smov (!%p341_p4, %s725_s29), 21  ;;  %p347_p5 = scmp.lt.s32.totalorder %s346_s28, 8  ;;  %vm395_vm0 = vcmask 261120   ;;  %v867_v16 = vmov 0   ;;  %v868_v17 = vmov 0.0   ;;  %vm546_vm9 = vcmask 523264  }
  0x13   : > { %s726_s8 = sshll.u32 %s986_s29, 2  ;;  %s734_s24 = sshll.u32 %s986_s29, 3  ;;  %819 = vset.pattern.permute.xlu0 %v867_v16  ;;  %396 = vst.msk [vmem:[#allocation2] sm:$0xff] %vm395_vm0, %v868_v17 }
  0x14   : > { %p357_p6 = scmp.lt.s32.totalorder %s356_s30, 8  ;;  %s988_s28 = smov (!%p347_p5, %s346_s28), 8  ;;  %397 = vst.msk [vmem:[#allocation2 + $0x8] sm:$0xff] %vm395_vm0, %v868_v17 }
  0x15   : > { %s780_s7 = sshll.u32 %s988_s28, 4  ;;  %s344_s18 = scalar_lea.vmem %s975_s1, %s726_s8 }
  0x16   : > { %s990_s30 = smov (!%p357_p6, %s356_s30), 8  ;;  %s354_s11 = scalar_lea.vmem %s976_s2, %s780_s7  ;;  %v783_v4 = vld [vmem:[%s344_s18] sm:$0xff] }
  0x17   : > { %s781_s12 = sshll.u32 %s990_s30, 4  ;;  %v785_v0 = vld [vmem:[%s354_s11 + $0x8] sm:$0xff]  ;;  %v784_v2 = vld [vmem:[%s354_s11] sm:$0xff]  ;;  %p368_p7 = scmp.lt.s32.totalorder %s366_s19, 8 }
  0x18   : > { %s364_s15 = scalar_lea.vmem %s977_s3, %s781_s12  ;;  %431 = vmatpush.bf16.msra.mxu0 %v785_v0  ;;  %s382_s30 = scalar_lea.vmem %s979_s5, %s734_s24 }
  0x19   : > { %v787_v1 = vld [vmem:[%s364_s15 + $0x8] sm:$0xff]  ;;  %v786_v3 = vld [vmem:[%s364_s15] sm:$0xff]  ;;  %s992_s19 = smov (!%p368_p7, %s366_s19), 8  ;;  %s388_s9 = scalar_lea.vmem %s980_s6, %s734_s24 }
  0x1a   : > { %461 = vmatpush.bf16.msra.mxu1 %v787_v1  ;;  %s782_s20 = sshll.u32 %s992_s19, 5  ;;  %v571_v15 = vld [vmem:[%s382_s30] sm:$0xff]  ;;  %v572_v21 = vld [vmem:[%s382_s30 + $0x8] sm:$0xff] }
  0x1b   : > { %s375_s23 = scalar_lea.vmem %s978_s4, %s782_s20  ;;  %577 = vperm.xlu0 %819, %v571_v15   ;;  %v511_v48 = vld [vmem:[#allocation2] sm:$0xff]  ;;  %v512_v51 = vld [vmem:[#allocation2 + $0x8] sm:$0xff] }
  0x1c   : > { %432 = vmatpush.bf16.msra.mxu0 %v784_v2  ;;  %v791_v5 = vld [vmem:[%s375_s23 + $0x18] sm:$0xff]  ;;  %v790_v6 = vld [vmem:[%s375_s23 + $0x10] sm:$0xff]  ;;  %v789_v9 = vld [vmem:[%s375_s23 + $0x8] sm:$0xff] }
  0x1d   : > { %554 = vmatpush.bf16.msra.mxu2 %v791_v5  ;;  %v788_v10 = vld [vmem:[%s375_s23] sm:$0xff] }
  0x1e   : > { %462 = vmatpush.bf16.msra.mxu1 %v786_v3 }
  0x1f   : > { %749 = vmatmul.msk.bf16.vlgmr.msra.gmra.mxu0 %vm395_vm0, %v783_v4 }
  0x21   : > { %758 = vmatmul.msk.bf16.vlgmr.msra.gmra.mxu1 %vm395_vm0, %v783_v4  ;;  %555 = vmatpush.bf16.msra.mxu2 %v790_v6 }
  0x23   : > { %582 = vperm.xlu0 %819, %v572_v21  }
  0x25   : > { %556 = vmatpush.bf16.msra.mxu2 %v789_v9 }
  0x29   : > { %557 = vmatpush.bf16.msra.mxu2 %v788_v10 }
  0x8d   : > { %v578_v52 = vpop.permute.xlu0 %577 }
  0x95   : > { %v583_v57 = vpop.permute.xlu0 %582 }
  0x9c   : > { %v434_v7 = vpop.f32.mrf.mxu0 }
  0x9d   : > { %v759_v8 = vmul.f32 -1.442695, %v434_v7 }
  0x9e   : > { %v464_v30 = vpop.f32.mrf.mxu1 }
  0x9f   : > { %820 = vpow2.f32 %v759_v8 }
  0xa4   : > { %v436_v11 = vpop.f32.mrf.mxu0 }
  0xa5   : > { %v821_v12 = vpop.eup %820  ;;  %v760_v13 = vmul.f32 -1.442695, %v436_v11 }
  0xa6   : > { %v475_v14 = vadd.f32 1.0, %v821_v12  ;;  %v466_v44 = vpop.f32.mrf.mxu1 }
  0xa7   : > { %822 = vpow2.f32 %v760_v13 }
  0xa8   : > { %824 = vrcp.f32 %v475_v14  ;;  %v488_v27 = vand.u32 2147483648, %v475_v14  ;;  %vm482_vm2 = vweird.f32 %v475_v14  ;;  %v486_v28 = vand.u32 2147483647, %v475_v14 }
  0xaa   : > { %v489_v33 = vor.u32 1.1754944e-38, %v488_v27  ;;  %vm487_vm4 = vcmp.eq.f32.partialorder %v486_v28, 8.507059e+37 }
  0xad   : > { %v823_v18 = vpop.eup %822 }
  0xae   : > { %v825_v19 = vpop.eup %824  ;;  %v476_v20 = vadd.f32 1.0, %v823_v18 }
  0xaf   : > { %v478_v22 = vmul.f32 %v825_v19, %v475_v14  ;;  %vm483_vm1 = vweird.f32 %v825_v19 }
  0xb0   : > { %826 = vrcp.f32 %v476_v20  ;;  %vm484_vm3 = vmor %vm482_vm2, %vm483_vm1  ;;  %v503_v34 = vand.u32 2147483648, %v476_v20  ;;  %v501_v36 = vand.u32 2147483647, %v476_v20  ;;  %vm497_vm6 = vweird.f32 %v476_v20 }
  0xb1   : > { %v479_v23 = vsub.f32 1.0, %v478_v22 }
  0xb2   : > { %v504_v39 = vor.u32 1.1754944e-38, %v503_v34  ;;  %vm502_vm8 = vcmp.eq.f32.partialorder %v501_v36, 8.507059e+37 }
  0xb3   : > { %v480_v24 = vmul.f32 %v825_v19, %v479_v23 }
  0xb5   : > { %v481_v25 = vadd.f32 %v825_v19, %v480_v24 }
  0xb6   : > { %v827_v26 = vpop.eup %826 }
  0xb7   : > { %v493_v29 = vmul.f32 %v827_v26, %v476_v20  ;;  %v485_v31 = vsel %vm484_vm3, %v825_v19, %v481_v25  ;;  %vm498_vm5 = vweird.f32 %v827_v26 }
  0xb8   : > { %v490_v37 = vsel %vm487_vm4, %v489_v33, %v485_v31  ;;  %vm499_vm7 = vmor %vm497_vm6, %vm498_vm5 }
  0xb9   : > { %v494_v32 = vsub.f32 1.0, %v493_v29  ;;  %v507_v40 = vmul.f32 %v490_v37, %v434_v7 }
  0xbb   : > { %v495_v35 = vmul.f32 %v827_v26, %v494_v32  ;;  %v509_v45 = vmul.f32 %v507_v40, %v464_v30 }
  0xbd   : > { %v496_v38 = vadd.f32 %v827_v26, %v495_v35 }
  0xbf   : > { %v500_v41 = vsel %vm499_vm7, %v827_v26, %v496_v38 }
  0xc0   : > { %v505_v42 = vsel %vm502_vm8, %v504_v39, %v500_v41 }
  0xc1   : > { %v508_v43 = vmul.f32 %v505_v42, %v436_v11 }
  0xc3   : > { %v510_v46 = vmul.f32 %v508_v43, %v466_v44 }
  0xc5   : > { %v513_v47 = vpack.c.bf16 %v510_v46, %v509_v45 }
  0xc7   : > { %777 = vmatmul.msk.bf16.vlgmr.msra.gmra.mxu2 %vm546_vm9, %v513_v47 }
 0x14a   : > { %v559_v49 = vpop.f32.mrf.mxu2 }
 0x14b   : > { %v564_v50 = vadd.f32 %v559_v49, %v511_v48 }
 0x14d   : > { %566 = vst.msk [vmem:[#allocation2] sm:$0xff] %vm395_vm0, %v564_v50 }
 0x152   : > { %v561_v53 = vpop.f32.mrf.mxu2 }
 0x153   : > { %v565_v54 = vadd.f32 %v561_v53, %v512_v51 }
 0x154   : > { %v573_v55 = vld [vmem:[#allocation2] sm:$0xff] }
 0x155   : > { %v585_v56 = vmul.f32 %v578_v52, %v573_v55  ;;  %567 = vst.msk [vmem:[#allocation2 + $0x8] sm:$0xff] %vm395_vm0, %v565_v54 }
 0x157   : > { %587 = vst.msk [vmem:[%s388_s9] sm:$0xff] %vm395_vm0, %v585_v56 }
 0x15c   : > { %v574_v58 = vld [vmem:[#allocation2 + $0x8] sm:$0xff] }
 0x15d   : > { %v586_v59 = vmul.f32 %v583_v57, %v574_v58 }
 0x15f   : > { %588 = vst.msk [vmem:[%s388_s9 + $0x8] sm:$0xff] %vm395_vm0, %v586_v59 }
 0x160 PF: > { %s24_s27 = sadd.s32 1, %s864_s27   ;;  %s981_s25 = smov %s860_s26 }
 0x161   : > { %p21_p8 = scmp.ge.s32.totalorder %s24_s27, 13   ;;  %s982_s26 = smov %s984_s0 }
 0x163   :  { %23 = sbr.rel (!%p21_p8) target bundleno = 8 (0x8), region = 90 }

</bundles_post_ra>
